<compile_context>
chip_gen: v6e
topology: v6e:2x2x1
jax: 0.10.0
libtpu: 0.0.40
codegen_flags: <defaults>
</compile_context>

<pallas_src>
import jax
import jax.numpy as jnp
from jax.experimental import pallas as pl
from jax.experimental.pallas import tpu as pltpu


def _round_up(v, m):
    return ((v + m - 1) // m) * m


def _cdiv(a, b):
    return (a + b - 1) // b


def _concat_squash_kernel(x_ref, w_ref, gate_ref, c_ref, o_ref):
    # (tb, dim_in) bf16 @ (dim_in, tn) bf16 on the MXU, f32 accumulation.
    res = jnp.dot(x_ref[...], w_ref[...], preferred_element_type=jnp.float32)
    # Fused epilogue in f32: res * gate + (bias*gate + hyper_bias_w*t).
    o_ref[...] = (res * gate_ref[...] + c_ref[...]).astype(o_ref.dtype)


def concat_squash_linear_sparse(t, x, weight_mask, weights, bias,
                                hyper_gate_w, hyper_gate_b, hyper_bias_w,
                                *, batch_tile=512, vmem_budget_bytes=40 << 20):
    """t: scalar f32; x: (B, dim_in). Returns (B, dim_out) f32."""
    f32 = jnp.float32
    B, dim_in = x.shape
    dim_out = weights.shape[0]

    # ---- Batch tiling: avoid padding blowup; give v7x's two TCs >= 2 tiles.
    n_bt = _cdiv(B, batch_tile)
    if n_bt == 1 and B >= 32:     # enough rows for two full bf16 (16-row) tiles
        n_bt = 2
    tb = _round_up(_cdiv(B, n_bt), 16)   # multiple of 16 for bf16 sublane packing
    b_pad = n_bt * tb

    # ---- Output tiling: lane-dense (multiple of 128); split dim_out when the
    # resident weight block would blow the VMEM budget (v7x: 64 MiB physical).
    dop = _round_up(dim_out, 128)

    def vmem_est(tn_):
        dim_in_p = _round_up(dim_in, 16)
        x_buf = 2 * tb * dim_in_p * 2        # bf16 x, double-buffered
        w_buf = 1 * dim_in_p * tn_ * 2       # bf16 w, single buffer (Buffered(1))
        vec_buf = 2 * 8 * tn_ * 4            # gate + c, f32, sublane-padded, single buffer
        out_buf = 2 * tb * tn_ * 4           # f32 out, double-buffered
        return x_buf + w_buf + vec_buf + out_buf

    tn = dop
    while tn > 128 and vmem_est(tn) > vmem_budget_bytes:
        tn -= 128
    n_nt = _cdiv(dop, tn)
    dop_pad = n_nt * tn

    # ---- Layout plumbing in the wrapper (once per call, not per grid step).
    # Mask in f32 (zeros stay exact), transpose, pad, then cast to bf16.
    w = (weight_mask.astype(f32) * weights.astype(f32)).T            # (dim_in, dim_out)
    w = jnp.pad(w, ((0, 0), (0, dop_pad - dim_out))).astype(jnp.bfloat16)

    t_f = jnp.asarray(t, f32)
    gate = jax.nn.sigmoid(hyper_gate_w.astype(f32) * t_f + hyper_gate_b.astype(f32))
    c = bias.astype(f32) * gate + hyper_bias_w.astype(f32) * t_f     # bias folded in

    def _vec(v):
        return jnp.pad(v.reshape(1, dim_out), ((0, 0), (0, dop_pad - dim_out)))

    gate_p = _vec(gate)                                              # (1, dop_pad) f32
    c_p = _vec(c)                                                    # (1, dop_pad) f32

    x_p = x.astype(jnp.bfloat16)
    if b_pad != B:
        x_p = jnp.pad(x_p, ((0, b_pad - B), (0, 0)))

    # ---- Block specs. Grid = (n_nt, n_bt): outer axis = output-column tiles
    # (so w/gate/c only change on the outer axis), inner axis streams batch tiles.
    x_spec = pl.BlockSpec((tb, dim_in), lambda j, i: (i, 0))
    w_spec = pl.BlockSpec((dim_in, tn), lambda j, i: (0, j),
                          pipeline_mode=pl.Buffered(1))
    vec_spec = pl.BlockSpec((1, tn), lambda j, i: (0, j),
                            pipeline_mode=pl.Buffered(1))
    out_spec = pl.BlockSpec((tb, tn), lambda j, i: (i, j))

    grid_spec = pltpu.PrefetchScalarGridSpec(
        num_scalar_prefetch=0,
        grid=(n_nt, n_bt),
        in_specs=[x_spec, w_spec, vec_spec, vec_spec],
        out_specs=out_spec,
    )

    est = vmem_est(tn)
    vmem_limit = int(min(max(est * 1.3 + (4 << 20), 32 << 20), 60 << 20))

    cost = pl.CostEstimate(
        flops=2 * b_pad * dim_in * dop_pad,
        transcendentals=0,                       # sigmoid hoisted to the wrapper
        bytes_accessed=(2 * b_pad * dim_in        # bf16 x
                        + 2 * dim_in * dop_pad    # bf16 w
                        + 4 * b_pad * dop_pad     # f32 out
                        + 2 * 4 * dop_pad),       # gate + c
    )

    out = pl.pallas_call(
        _concat_squash_kernel,
        out_shape=jax.ShapeDtypeStruct((b_pad, dop_pad), jnp.float32),
        grid_spec=grid_spec,
        compiler_params=pltpu.CompilerParams(
            dimension_semantics=("parallel", "parallel"),
            vmem_limit_bytes=vmem_limit),
        cost_estimate=cost,
    )(x_p, w, gate_p, c_p)

    # Slice away batch padding and padded output lanes (benign zeros).
    # TODO(synk): for dim_out << 128 with very large B, benchmark a true-width
    # (masked-store) or bf16 output to cut the padded writeback stream.
    return out[:B, :dim_out]


def _reference(t, x, weight_mask, weights, bias,
               hyper_gate_w, hyper_gate_b, hyper_bias_w):
    w = weight_mask * weights
    res = x @ w.T + bias[None, :]
    gate = jax.nn.sigmoid(hyper_gate_w * t + hyper_gate_b)[None, :]
    hb = (hyper_bias_w * t)[None, :]
    return res * gate + hb


if __name__ == "__main__":
    key = jax.random.PRNGKey(0)
    k_adj, k_x, k_w, k_b, k_hgw, k_hgb, k_hbw = jax.random.split(key, 7)

    batch, dim_in, dim_out = 8, 16, 32
    adj_rows, adj_cols = 24, 12   # adjacency smaller than (dim_out, dim_in)

    # Adjacency: deterministic 0/1 matrix (as in the module's constructor).
    adjacency = (jax.random.uniform(k_adj, (adj_rows, adj_cols)) > 0.5).astype(jnp.float32)
    weight_mask = jnp.zeros((dim_out, dim_in), jnp.float32)
    weight_mask = weight_mask.at[:adj_rows, :adj_cols].set(adjacency)

    # nn.Linear-style deterministic init: U(-1/sqrt(fan_in), 1/sqrt(fan_in)).
    lim = 1.0 / jnp.sqrt(jnp.float32(dim_in))
    weights = jax.random.uniform(k_w, (dim_out, dim_in), minval=-lim, maxval=lim)
    bias = jax.random.uniform(k_b, (dim_out,), minval=-lim, maxval=lim)
    # hyper layers have fan_in = 1 -> U(-1, 1)
    hyper_gate_w = jax.random.uniform(k_hgw, (dim_out,), minval=-1.0, maxval=1.0)
    hyper_gate_b = jax.random.uniform(k_hgb, (dim_out,), minval=-1.0, maxval=1.0)
    hyper_bias_w = jax.random.uniform(k_hbw, (dim_out,), minval=-1.0, maxval=1.0)

    x = jax.random.normal(k_x, (batch, dim_in), jnp.float32)
    t = jnp.float32(0.37)

    out = concat_squash_linear_sparse(t, x, weight_mask, weights, bias,
                                      hyper_gate_w, hyper_gate_b, hyper_bias_w)
    out = jax.block_until_ready(out)

    ref = _reference(t, x, weight_mask, weights, bias,
                     hyper_gate_w, hyper_gate_b, hyper_bias_w)
    assert out.shape == (batch, dim_out)
    # bf16 MXU operands (f32 accumulation) -> relaxed tolerance vs f32 reference.
    assert jnp.allclose(out, ref, atol=2e-2, rtol=2e-2), "mismatch vs reference"

    print("KERNEL_OK")
</pallas_src>

<mosaic_0001>
module attributes {stable_mosaic.version = 11 : i64} {
  func.func @_concat_squash_kernel(%arg0: i32, %arg1: i32, %arg2: memref<16x16xbf16, #tpu.memory_space<vmem>>, %arg3: memref<16x128xbf16, #tpu.memory_space<vmem>>, %arg4: memref<1x128xf32, #tpu.memory_space<vmem>>, %arg5: memref<1x128xf32, #tpu.memory_space<vmem>>, %arg6: memref<16x128xf32, #tpu.memory_space<vmem>>) attributes {dimension_semantics = [#tpu.dimension_semantics<parallel>, #tpu.dimension_semantics<parallel>], iteration_bounds = array<i64: 1, 1>, scalar_prefetch = 0 : i64, scratch_operands = 0 : i64, tpu.core_type = #tpu.core_type<tc>, window_params = [{transform_indices = @transform_0, window_bounds = array<i64: 16, 16>}, {pipeline_mode = #tpu.pipeline_mode<synchronous>, transform_indices = @transform_1, window_bounds = array<i64: 16, 128>}, {pipeline_mode = #tpu.pipeline_mode<synchronous>, transform_indices = @transform_2, window_bounds = array<i64: 1, 128>}, {pipeline_mode = #tpu.pipeline_mode<synchronous>, transform_indices = @transform_3, window_bounds = array<i64: 1, 128>}, {transform_indices = @transform_4, window_bounds = array<i64: 16, 128>}]} {
    %c0 = arith.constant 0 : index
    %c0_0 = arith.constant 0 : index
    %0 = vector.load %arg2[%c0, %c0_0] : memref<16x16xbf16, #tpu.memory_space<vmem>>, vector<16x16xbf16>
    %c0_1 = arith.constant 0 : index
    %c0_2 = arith.constant 0 : index
    %1 = vector.load %arg3[%c0_1, %c0_2] : memref<16x128xbf16, #tpu.memory_space<vmem>>, vector<16x128xbf16>
    %cst = arith.constant dense<0.000000e+00> : vector<16x128xf32>
    %2 = tpu.matmul %0, %1, %cst {dimension_numbers = #tpu.dot_dimension_numbers<[1], [0], [0], [1], [0, 0, 1, 1], [], []>} : vector<16x16xbf16>, vector<16x128xbf16>, vector<16x128xf32> -> vector<16x128xf32>
    %c0_3 = arith.constant 0 : index
    %c0_4 = arith.constant 0 : index
    %3 = vector.load %arg4[%c0_3, %c0_4] : memref<1x128xf32, #tpu.memory_space<vmem>>, vector<1x128xf32>
    %4 = vector.broadcast %3 : vector<1x128xf32> to vector<16x128xf32>
    %5 = arith.mulf %2, %4 : vector<16x128xf32>
    %c0_5 = arith.constant 0 : index
    %c0_6 = arith.constant 0 : index
    %6 = vector.load %arg5[%c0_5, %c0_6] : memref<1x128xf32, #tpu.memory_space<vmem>>, vector<1x128xf32>
    %7 = vector.broadcast %6 : vector<1x128xf32> to vector<16x128xf32>
    %8 = arith.addf %5, %7 : vector<16x128xf32>
    %c0_7 = arith.constant 0 : index
    %c0_8 = arith.constant 0 : index
    %9 = vector.load %arg6[%c0_7, %c0_8] : memref<16x128xf32, #tpu.memory_space<vmem>>, vector<16x128xf32>
    tpu.vector_store %arg6[%c0_7, %c0_8], %8 {strides = array<i32>} : memref<16x128xf32, #tpu.memory_space<vmem>>, vector<16x128xf32>,
    return
  }
  func.func @transform_0(%arg0: i32, %arg1: i32) -> (i32, i32) {
    %c0_i32 = arith.constant 0 : i32
    %c0_i32_0 = arith.constant 0 : i32
    return %arg1, %c0_i32 : i32, i32
  }
  func.func @transform_1(%arg0: i32, %arg1: i32) -> (i32, i32) {
    %c0_i32 = arith.constant 0 : i32
    %c0_i32_0 = arith.constant 0 : i32
    return %c0_i32, %arg0 : i32, i32
  }
  func.func @transform_2(%arg0: i32, %arg1: i32) -> (i32, i32) {
    %c0_i32 = arith.constant 0 : i32
    %c0_i32_0 = arith.constant 0 : i32
    return %c0_i32, %arg0 : i32, i32
  }
  func.func @transform_3(%arg0: i32, %arg1: i32) -> (i32, i32) {
    %c0_i32 = arith.constant 0 : i32
    %c0_i32_0 = arith.constant 0 : i32
    return %c0_i32, %arg0 : i32, i32
  }
  func.func @transform_4(%arg0: i32, %arg1: i32) -> (i32, i32) {
    %c0_i32 = arith.constant 0 : i32
    return %arg1, %arg0 : i32, i32
  }
}

</mosaic_0001>

<bundles_post_ra>
// kernel: tpu_custom_call.1
= control target key start
LH: loop header
LB: loop body
LE: loop exit
PB: predicated region body
PF: predicated region fallthrough
CT: control target
= control target key end

     0   :  { %9 = vsyncpa [#allocation3], 0  ;;  %s284_s0 = inlined_call_operand.hbm [shape: bf16[16,16], index: 0, kind: input, shape index: {}]   ;;  %s285_s1 = inlined_call_operand.hbm [shape: bf16[16,128], index: 1, kind: input, shape index: {}]   ;;  %s286_s2 = inlined_call_operand.vmem [shape: f32[1,128], index: 2, kind: input, shape index: {}]   ;;  %s287_s3 = inlined_call_operand.vmem [shape: f32[1,128], index: 3, kind: input, shape index: {}]   ;;  %s288_s4 = inlined_call_operand.hbm [shape: f32[16,128], index: 4, kind: output, shape index: {}]  }
   0x1   :  { %10 = vsyncpa [#allocation6], 0 }
   0x2   :  { %11 = vsyncpa [#allocation4], 0  ;;  %s235_s15 = smov [#allocation2]  }
   0x3   :  { %s17_s16 = sshll.u32 %s235_s15, 4  ;;  %s18_s16 = int_to_ptr.vmem [resolvable:$true] %s17_s16 }
   0x4   :  { %s177_s17 = scalar_lea.vmem %s18_s16, 128  ;;  %p182_p1 = scmp.lt.s32.totalorder %s18_s16, %s18_s16 }
   0x5   :  { %p178_p0 = scmp.ne.s32.totalorder %s18_s16, %s177_s17  ;;  %p183_p2 = scmp.lt.s32.totalorder %s177_s17, %s177_s17 }
   0x7   :  { %p184_p3 = por %p183_p2, %p182_p1 }
   0x9   :  { %p185_p4 = pnand %p184_p3, %p178_p0 }
   0xb   :  { %188 = shalt.err (!%p185_p4)
}
   0xc   :  { %s236_s18 = smov 64   ;;  %s237_s19 = smov 4  }
   0xd   :  { %23 = dma.hbm_to_vmem [thread:$0]  %s284_s0, 128, %s18_s16, [#allocation3], %s236_s18, %s236_s18, %s237_s19  }
   0xe   :  { %s238_s22 = smov [#allocation5]  }
   0xf   :  { %s29_s23 = sshll.u32 %s238_s22, 4  ;;  %s30_s23 = int_to_ptr.vmem [resolvable:$true] %s29_s23 }
  0x10   :  { %s197_s24 = scalar_lea.vmem %s30_s23, 128  ;;  %p202_p6 = scmp.lt.s32.totalorder %s30_s23, %s30_s23 }
  0x11   :  { %p198_p5 = scmp.ne.s32.totalorder %s30_s23, %s197_s24  ;;  %p203_p7 = scmp.lt.s32.totalorder %s197_s24, %s197_s24 }
  0x13   :  { %p204_p8 = por %p203_p7, %p202_p6 }
  0x15   :  { %p205_p9 = pnand %p204_p8, %p198_p5 }
  0x17   :  { %208 = shalt.err (!%p205_p9)
}
  0x18   :  { %35 = dma.hbm_to_vmem [thread:$0]  %s285_s1, 128, %s30_s23, [#allocation6], %s236_s18, %s236_s18, %s237_s19  }
  0x19   :  { %229 = dma.done.wait [#allocation3], 128  }
  0x1a   :  { %230 = vsyncadd [#allocation3], 4294967168 }
  0x1b   :  { %231 = dma.done.wait [#allocation6], 128  }
  0x1c   :  { %232 = vsyncadd [#allocation6], 4294967168  ;;  %v239_v0 = vmov 0.0   ;;  %vm240_vm0 = vmmov 0   ;;  %v167_v1 = vld [vmem:[#allocation5] sm:$0xff]   ;;  %v168_v2 = vld [vmem:[#allocation2] sm:$0xff]  }
  0x1d   :  { %152 = vmatprep.subr.bf16.mxu0 %v239_v0  ;;  %154 = vmatprep.mubr.msk.bf16.mxu0 %vm240_vm0, %v239_v0  ;;  %vm62_vm1 = vcmask 130048   ;;  %v148_v3 = vld [vmem:[%s286_s2] ss:$0 sm:$0xff]  ;;  %s241_s29 = smov [#allocation7]  }
  0x1e   :  { %153 = vmatpush3.bf16.msra.mxu0 %v167_v1  ;;  %v149_v5 = vld [vmem:[%s287_s3] ss:$0 sm:$0xff]  ;;  %s132_s30 = sshll.u32 %s241_s29, 4  ;;  %s133_s30 = int_to_ptr.vmem [resolvable:$true] %s132_s30 }
  0x1f   :  { %s209_s5 = scalar_lea.vmem %s133_s30, 256  ;;  %p214_p11 = scmp.lt.s32.totalorder %s133_s30, %s133_s30 }
  0x20   :  { %p210_p10 = scmp.ne.s32.totalorder %s133_s30, %s209_s5  ;;  %p215_p12 = scmp.lt.s32.totalorder %s209_s5, %s209_s5 }
  0x21   :  { %155 = vmatmul.mubr.msk.bf16.vlgmr.msra.gmra.mxu0 %vm62_vm1, %v168_v2 }
  0x22   :  { %p216_p13 = por %p215_p12, %p214_p11 }
  0x24   :  { %p217_p0 = pnand %p216_p13, %p210_p10 }
  0xe1   :  { %v100_v4 = vpop.f32.mrf.mxu0 }
  0xe2   :  { %v114_v6 = vmul.f32 %v148_v3, %v100_v4 }
  0xe3   :  { %v156_v7 = vpop.f32.mrf.mxu0 }
  0xe4   :  { %v123_v8 = vadd.f32 %v149_v5, %v114_v6 }
  0xe5   :  { %v103_v9 = vpop.f32.mrf.mxu0 }
  0xe6   :  { %125 = vst [vmem:[#allocation7] sm:$0xff] %v123_v8  ;;  %v115_v10 = vmul.f32 %v148_v3, %v103_v9 }
  0xe7   :  { %v157_v11 = vpop.f32.mrf.mxu0 }
  0xe8   :  { %v124_v12 = vadd.f32 %v149_v5, %v115_v10 }
  0xea   :  { %126 = vst [vmem:[#allocation7 + $0x8] sm:$0xff] %v124_v12 }
  0xeb   :  { %220 = shalt.err (!%p217_p0)
}
  0xec   :  { %s242_s2 = smov 128   ;;  %s243_s3 = smov 8  }
  0xed   :  { %138 = dma.vmem_to_hbm [thread:$0]  %s133_s30, 256, %s288_s4, [#allocation4], %s242_s2, %s242_s2, %s243_s3  }
  0xee   :  { %233 = dma.done.wait [#allocation4], 256  }
  0xef   :  { %234 = vsyncadd [#allocation4], 4294967040 }
  0xf0   :  { %142 = vsyncpa [#allocation3], 1 }
  0xf1   :  { %143 = vsyncpa [#allocation6], 1 }
  0xf2   :  { %144 = vsyncpa [#allocation4], 1 }

</bundles_post_ra>
